<compile_context>
chip_gen: v6e
topology: v6e:2x2x1
jax: 0.10.0
libtpu: 0.0.40
codegen_flags: <defaults>
</compile_context>

<pallas_src>
import jax
import jax.numpy as jnp
from jax.experimental import pallas as pl
from jax.experimental.pallas import tpu as pltpu  # noqa: F401  (TPU backend)

ROWS, COLS = 6, 7
IN_F = ROWS * COLS          # 42
HID = 30
OUT_F = COLS                # 7

LANE = 128                  # padded feature width (lane-dense)
SUB = 8                     # padded batch (sublane-aligned)


# ---------------------------------------------------------------------------
# Fused Pallas kernel: whole MLP in one invocation, everything in VMEM
# ---------------------------------------------------------------------------
def _sigmoid(x):
    # Explicit logistic (EUP exp + VPU), f32 throughout.
    return 1.0 / (1.0 + jnp.exp(-x))


def _mlp_kernel(x_ref, w1_ref, b1_ref, w2_ref, b2_ref,
                w3_ref, b3_ref, w4_ref, b4_ref, o_ref):
    # x_ref: (M_pad, 128); w*_ref: (128, 128); b*_ref: (1, 128); o_ref: (M_pad, 128)
    h = jnp.dot(x_ref[...], w1_ref[...], preferred_element_type=jnp.float32)
    h = _sigmoid(h + b1_ref[...])

    h = jnp.dot(h, w2_ref[...], preferred_element_type=jnp.float32)
    # TODO(synk): nn.Dropout(0.5) is inference-mode identity here; training-mode
    # stochastic masking (pltpu.prng_*) intentionally omitted.
    h = _sigmoid(h + b2_ref[...])

    h = jnp.dot(h, w3_ref[...], preferred_element_type=jnp.float32)
    h = _sigmoid(h + b3_ref[...])

    o_ref[...] = (jnp.dot(h, w4_ref[...], preferred_element_type=jnp.float32)
                  + b4_ref[...])


# ---------------------------------------------------------------------------
# Parameter handling
# ---------------------------------------------------------------------------
def init_params(key):
    """Weights stored as (in, out) so the forward is x @ W + b."""
    ks = jax.random.split(key, 8)
    s = 0.1
    return {
        "w1": jax.random.normal(ks[0], (IN_F, HID), jnp.float32) * s,
        "b1": jax.random.normal(ks[1], (HID,), jnp.float32) * s,
        "w2": jax.random.normal(ks[2], (HID, HID), jnp.float32) * s,
        "b2": jax.random.normal(ks[3], (HID,), jnp.float32) * s,
        "w3": jax.random.normal(ks[4], (HID, HID), jnp.float32) * s,
        "b3": jax.random.normal(ks[5], (HID,), jnp.float32) * s,
        "w4": jax.random.normal(ks[6], (HID, OUT_F), jnp.float32) * s,
        "b4": jax.random.normal(ks[7], (OUT_F,), jnp.float32) * s,
    }


def _pad2d(a, rows, cols):
    return jnp.zeros((rows, cols), a.dtype).at[:a.shape[0], :a.shape[1]].set(a)


def prepare_padded_params(p):
    """One-time zero-padding of all weights/biases to (128,128)/(1,128).

    Zero rows/cols guarantee padded lanes never contaminate real outputs:
    sigmoid(0)=0.5 in padded hidden lanes multiplies zero weight rows in the
    next layer, and padded output lanes are sliced off at the end.
    """
    out = []
    for wk, bk in (("w1", "b1"), ("w2", "b2"), ("w3", "b3"), ("w4", "b4")):
        out.append(_pad2d(p[wk], LANE, LANE))
        out.append(_pad2d(p[bk][None, :], 1, LANE))
    return tuple(out)


# ---------------------------------------------------------------------------
# Forward passes
# ---------------------------------------------------------------------------
@jax.jit
def forward_pallas(x, padded_params):
    B = x.shape[0]
    xf = x.reshape(B, -1).astype(jnp.float32)                    # (B, 42)
    m_pad = max(SUB, ((B + SUB - 1) // SUB) * SUB)
    x_pad = jnp.zeros((m_pad, LANE), jnp.float32).at[:B, :IN_F].set(xf)

    out = pl.pallas_call(
        _mlp_kernel,
        out_shape=jax.ShapeDtypeStruct((m_pad, LANE), jnp.float32),
    )(x_pad, *padded_params)
    return out[:B, :OUT_F]                                        # (B, 7)


@jax.jit
def forward_ref(x, p):
    h = x.reshape(x.shape[0], -1).astype(jnp.float32)
    h = jax.nn.sigmoid(h @ p["w1"] + p["b1"])
    h = jax.nn.sigmoid(h @ p["w2"] + p["b2"])   # dropout is identity at inference
    h = jax.nn.sigmoid(h @ p["w3"] + p["b3"])
    return h @ p["w4"] + p["b4"]


# ---------------------------------------------------------------------------
if __name__ == "__main__":
    key = jax.random.PRNGKey(0)
    k_param, k_x = jax.random.split(key)

    params = init_params(k_param)
    padded_params = prepare_padded_params(params)

    # Board-like input in {-1, 0, 1}, shape (batch=2, rows=6, cols=7)
    x = jax.random.randint(k_x, (2, ROWS, COLS), -1, 2).astype(jnp.float32)

    out = forward_pallas(x, padded_params)
    out = jax.block_until_ready(out)

    ref = forward_ref(x, params)
    assert out.shape == (2, COLS), out.shape
    assert jnp.allclose(out, ref, atol=1e-5, rtol=1e-5), (
        f"max abs err {jnp.max(jnp.abs(out - ref))}")

    print("KERNEL_OK")
</pallas_src>

<mosaic_0001>
module attributes {stable_mosaic.version = 11 : i64} {
  func.func @_mlp_kernel(%arg0: memref<8x128xf32, #tpu.memory_space<vmem>>, %arg1: memref<128x128xf32, #tpu.memory_space<vmem>>, %arg2: memref<1x128xf32, #tpu.memory_space<vmem>>, %arg3: memref<128x128xf32, #tpu.memory_space<vmem>>, %arg4: memref<1x128xf32, #tpu.memory_space<vmem>>, %arg5: memref<128x128xf32, #tpu.memory_space<vmem>>, %arg6: memref<1x128xf32, #tpu.memory_space<vmem>>, %arg7: memref<128x128xf32, #tpu.memory_space<vmem>>, %arg8: memref<1x128xf32, #tpu.memory_space<vmem>>, %arg9: memref<8x128xf32, #tpu.memory_space<vmem>>) attributes {dimension_semantics = [], scalar_prefetch = 0 : i64, scratch_operands = 0 : i64, tpu.core_type = #tpu.core_type<tc>} {
    %c0 = arith.constant 0 : index
    %c0_0 = arith.constant 0 : index
    %0 = vector.load %arg0[%c0, %c0_0] : memref<8x128xf32, #tpu.memory_space<vmem>>, vector<8x128xf32>
    %c0_1 = arith.constant 0 : index
    %c0_2 = arith.constant 0 : index
    %1 = vector.load %arg1[%c0_1, %c0_2] : memref<128x128xf32, #tpu.memory_space<vmem>>, vector<128x128xf32>
    %cst = arith.constant dense<0.000000e+00> : vector<8x128xf32>
    %2 = tpu.matmul %0, %1, %cst {dimension_numbers = #tpu.dot_dimension_numbers<[1], [0], [0], [1], [0, 0, 1, 1], [], []>} : vector<8x128xf32>, vector<128x128xf32>, vector<8x128xf32> -> vector<8x128xf32>
    %c0_3 = arith.constant 0 : index
    %c0_4 = arith.constant 0 : index
    %3 = vector.load %arg2[%c0_3, %c0_4] : memref<1x128xf32, #tpu.memory_space<vmem>>, vector<1x128xf32>
    %4 = vector.broadcast %3 : vector<1x128xf32> to vector<8x128xf32>
    %5 = arith.addf %2, %4 : vector<8x128xf32>
    %cst_5 = arith.constant 0.000000e+00 : f32
    %6 = vector.broadcast %cst_5 : f32 to vector<8x128xf32>
    %7 = arith.subf %6, %5 : vector<8x128xf32>
    %8 = math.exp %7 : vector<8x128xf32>
    %cst_6 = arith.constant 1.000000e+00 : f32
    %9 = vector.broadcast %cst_6 : f32 to vector<8x128xf32>
    %10 = arith.addf %9, %8 : vector<8x128xf32>
    %cst_7 = arith.constant 1.000000e+00 : f32
    %11 = vector.broadcast %cst_7 : f32 to vector<8x128xf32>
    %12 = arith.divf %11, %10 : vector<8x128xf32>
    %c0_8 = arith.constant 0 : index
    %c0_9 = arith.constant 0 : index
    %13 = vector.load %arg3[%c0_8, %c0_9] : memref<128x128xf32, #tpu.memory_space<vmem>>, vector<128x128xf32>
    %cst_10 = arith.constant dense<0.000000e+00> : vector<8x128xf32>
    %14 = tpu.matmul %12, %13, %cst_10 {dimension_numbers = #tpu.dot_dimension_numbers<[1], [0], [0], [1], [0, 0, 1, 1], [], []>} : vector<8x128xf32>, vector<128x128xf32>, vector<8x128xf32> -> vector<8x128xf32>
    %c0_11 = arith.constant 0 : index
    %c0_12 = arith.constant 0 : index
    %15 = vector.load %arg4[%c0_11, %c0_12] : memref<1x128xf32, #tpu.memory_space<vmem>>, vector<1x128xf32>
    %16 = vector.broadcast %15 : vector<1x128xf32> to vector<8x128xf32>
    %17 = arith.addf %14, %16 : vector<8x128xf32>
    %cst_13 = arith.constant 0.000000e+00 : f32
    %18 = vector.broadcast %cst_13 : f32 to vector<8x128xf32>
    %19 = arith.subf %18, %17 : vector<8x128xf32>
    %20 = math.exp %19 : vector<8x128xf32>
    %cst_14 = arith.constant 1.000000e+00 : f32
    %21 = vector.broadcast %cst_14 : f32 to vector<8x128xf32>
    %22 = arith.addf %21, %20 : vector<8x128xf32>
    %cst_15 = arith.constant 1.000000e+00 : f32
    %23 = vector.broadcast %cst_15 : f32 to vector<8x128xf32>
    %24 = arith.divf %23, %22 : vector<8x128xf32>
    %c0_16 = arith.constant 0 : index
    %c0_17 = arith.constant 0 : index
    %25 = vector.load %arg5[%c0_16, %c0_17] : memref<128x128xf32, #tpu.memory_space<vmem>>, vector<128x128xf32>
    %cst_18 = arith.constant dense<0.000000e+00> : vector<8x128xf32>
    %26 = tpu.matmul %24, %25, %cst_18 {dimension_numbers = #tpu.dot_dimension_numbers<[1], [0], [0], [1], [0, 0, 1, 1], [], []>} : vector<8x128xf32>, vector<128x128xf32>, vector<8x128xf32> -> vector<8x128xf32>
    %c0_19 = arith.constant 0 : index
    %c0_20 = arith.constant 0 : index
    %27 = vector.load %arg6[%c0_19, %c0_20] : memref<1x128xf32, #tpu.memory_space<vmem>>, vector<1x128xf32>
    %28 = vector.broadcast %27 : vector<1x128xf32> to vector<8x128xf32>
    %29 = arith.addf %26, %28 : vector<8x128xf32>
    %cst_21 = arith.constant 0.000000e+00 : f32
    %30 = vector.broadcast %cst_21 : f32 to vector<8x128xf32>
    %31 = arith.subf %30, %29 : vector<8x128xf32>
    %32 = math.exp %31 : vector<8x128xf32>
    %cst_22 = arith.constant 1.000000e+00 : f32
    %33 = vector.broadcast %cst_22 : f32 to vector<8x128xf32>
    %34 = arith.addf %33, %32 : vector<8x128xf32>
    %cst_23 = arith.constant 1.000000e+00 : f32
    %35 = vector.broadcast %cst_23 : f32 to vector<8x128xf32>
    %36 = arith.divf %35, %34 : vector<8x128xf32>
    %c0_24 = arith.constant 0 : index
    %c0_25 = arith.constant 0 : index
    %37 = vector.load %arg7[%c0_24, %c0_25] : memref<128x128xf32, #tpu.memory_space<vmem>>, vector<128x128xf32>
    %cst_26 = arith.constant dense<0.000000e+00> : vector<8x128xf32>
    %38 = tpu.matmul %36, %37, %cst_26 {dimension_numbers = #tpu.dot_dimension_numbers<[1], [0], [0], [1], [0, 0, 1, 1], [], []>} : vector<8x128xf32>, vector<128x128xf32>, vector<8x128xf32> -> vector<8x128xf32>
    %c0_27 = arith.constant 0 : index
    %c0_28 = arith.constant 0 : index
    %39 = vector.load %arg8[%c0_27, %c0_28] : memref<1x128xf32, #tpu.memory_space<vmem>>, vector<1x128xf32>
    %40 = vector.broadcast %39 : vector<1x128xf32> to vector<8x128xf32>
    %41 = arith.addf %38, %40 : vector<8x128xf32>
    %c0_29 = arith.constant 0 : index
    %c0_30 = arith.constant 0 : index
    %42 = vector.load %arg9[%c0_29, %c0_30] : memref<8x128xf32, #tpu.memory_space<vmem>>, vector<8x128xf32>
    tpu.vector_store %arg9[%c0_29, %c0_30], %41 {strides = array<i32>} : memref<8x128xf32, #tpu.memory_space<vmem>>, vector<8x128xf32>,
    return
  }
}

</mosaic_0001>

<bundles_post_ra>
// kernel: forward_pallas.1
= control target key start
LH: loop header
LB: loop body
LE: loop exit
PB: predicated region body
PF: predicated region fallthrough
CT: control target
= control target key end

     0   :  { %14 = vsyncpa [#allocation3], 0  ;;  %s976_s0 = inlined_call_operand.vmem [shape: f32[8,128], index: 0, kind: input, shape index: {}]   ;;  %s977_s1 = inlined_call_operand.hbm [shape: f32[128,128], index: 1, kind: input, shape index: {}]   ;;  %s978_s2 = inlined_call_operand.vmem [shape: f32[1,128], index: 2, kind: input, shape index: {}]   ;;  %s979_s3 = inlined_call_operand.hbm [shape: f32[128,128], index: 3, kind: input, shape index: {}]   ;;  %s980_s4 = inlined_call_operand.vmem [shape: f32[1,128], index: 4, kind: input, shape index: {}]   ;;  %s981_s5 = inlined_call_operand.hbm [shape: f32[128,128], index: 5, kind: input, shape index: {}]   ;;  %s982_s6 = inlined_call_operand.vmem [shape: f32[1,128], index: 6, kind: input, shape index: {}]   ;;  %s983_s7 = inlined_call_operand.hbm [shape: f32[128,128], index: 7, kind: input, shape index: {}]   ;;  %s984_s8 = inlined_call_operand.vmem [shape: f32[1,128], index: 8, kind: input, shape index: {}]   ;;  %s985_s9 = inlined_call_operand.vmem [shape: f32[8,128], index: 9, kind: output, shape index: {}]  }
   0x1   :  { %15 = vsyncpa [#allocation5], 0 }
   0x2   :  { %16 = vsyncpa [#allocation8], 0  ;;  %s804_s30 = smov [#allocation4]   ;;  %s805_s11 = smov [#allocation2]  }
   0x3   :  { %s38_s10 = sshll.u32 %s804_s30, 4  ;;  %s24_s12 = sshll.u32 %s805_s11, 4  ;;  %s39_s10 = int_to_ptr.vmem [resolvable:$true] %s38_s10  ;;  %s25_s12 = int_to_ptr.vmem [resolvable:$true] %s24_s12 }
   0x4   :  { %s726_s13 = scalar_lea.vmem %s39_s10, 2048  ;;  %p731_p1 = scmp.lt.s32.totalorder %s39_s10, %s39_s10 }
   0x5   :  { %p727_p0 = scmp.ne.s32.totalorder %s39_s10, %s726_s13  ;;  %p732_p2 = scmp.lt.s32.totalorder %s726_s13, %s726_s13 }
   0x7   :  { %p733_p3 = por %p732_p2, %p731_p1 }
   0x9   :  { %p734_p4 = pnand %p733_p3, %p727_p0 }
   0xb   :  { %737 = shalt.err (!%p734_p4)
}
   0xc   :  { %s806_s14 = smov 128   ;;  %s807_s15 = smov 8  }
   0xd   :  { %44 = dma.hbm_to_vmem [thread:$0]  %s979_s3, 2048, %s39_s10, [#allocation5], %s806_s14, %s806_s14, %s807_s15  }
   0xe   :  { %s746_s18 = scalar_lea.vmem %s25_s12, 2048  ;;  %p751_p6 = scmp.lt.s32.totalorder %s25_s12, %s25_s12 }
   0xf   :  { %p747_p5 = scmp.ne.s32.totalorder %s25_s12, %s746_s18  ;;  %p752_p7 = scmp.lt.s32.totalorder %s746_s18, %s746_s18 }
  0x11   :  { %p753_p8 = por %p752_p7, %p751_p6 }
  0x13   :  { %p754_p9 = pnand %p753_p8, %p747_p5 }
  0x15   :  { %757 = shalt.err (!%p754_p9)
}
  0x16   :  { %30 = dma.hbm_to_vmem [thread:$0]  %s977_s1, 2048, %s25_s12, [#allocation3], %s806_s14, %s806_s14, %s807_s15  }
  0x17   :  { %s808_s21 = smov [#allocation6]   ;;  %s809_s23 = smov [#allocation7]  }
  0x18   :  { %s52_s22 = sshll.u32 %s808_s21, 4  ;;  %s66_s24 = sshll.u32 %s809_s23, 4  ;;  %s53_s22 = int_to_ptr.vmem [resolvable:$true] %s52_s22  ;;  %s67_s24 = int_to_ptr.vmem [resolvable:$true] %s66_s24 }
  0x19   :  { %s766_s3 = scalar_lea.vmem %s53_s22, 2048  ;;  %p771_p11 = scmp.lt.s32.totalorder %s53_s22, %s53_s22 }
  0x1a   :  { %p767_p10 = scmp.ne.s32.totalorder %s53_s22, %s766_s3  ;;  %p772_p12 = scmp.lt.s32.totalorder %s766_s3, %s766_s3 }
  0x1c   :  { %p773_p13 = por %p772_p12, %p771_p11 }
  0x1e   :  { %p774_p0 = pnand %p773_p13, %p767_p10 }
  0x20   :  { %777 = shalt.err (!%p774_p0)
}
  0x21   :  { %58 = dma.hbm_to_vmem [thread:$0]  %s981_s5, 2048, %s53_s22, [#allocation5], %s806_s14, %s806_s14, %s807_s15  }
  0x22   :  { %s786_s1 = scalar_lea.vmem %s67_s24, 2048  ;;  %p791_p2 = scmp.lt.s32.totalorder %s67_s24, %s67_s24 }
  0x23   :  { %p787_p1 = scmp.ne.s32.totalorder %s67_s24, %s786_s1  ;;  %p792_p3 = scmp.lt.s32.totalorder %s786_s1, %s786_s1 }
  0x25   :  { %p793_p4 = por %p792_p3, %p791_p2 }
  0x27   :  { %p794_p5 = pnand %p793_p4, %p787_p1 }
  0x29   :  { %797 = shalt.err (!%p794_p5)
}
  0x2a   :  { %72 = dma.hbm_to_vmem [thread:$0]  %s983_s7, 2048, %s67_s24, [#allocation8], %s806_s14, %s806_s14, %s807_s15  }
  0x2b   :  { %798 = dma.done.wait [#allocation3], 2048  }
  0x2c   :  { %799 = vsyncadd [#allocation3], 4294965248 }
  0x2d   :  { %800 = dma.done.wait [#allocation5], 4096  }
  0x2e   :  { %801 = vsyncadd [#allocation5], 4294963200 }
  0x2f   :  { %802 = dma.done.wait [#allocation8], 2048  }
  0x30   :  { %803 = vsyncadd [#allocation8], 4294965248  ;;  %v810_v0 = vmov 0.0   ;;  %vm811_vm0 = vmmov 0   ;;  %v103_v1 = vld [vmem:[#allocation2 + $0x78] sm:$0xff]  ;;  %v102_v2 = vld [vmem:[#allocation2 + $0x70] sm:$0xff] }
  0x31   :  { %558 = vmatprep.subr.mxu0 %v810_v0  ;;  %590 = vmatprep.mubr.msk.f32.mxu0 %vm811_vm0, %v810_v0  ;;  %v101_v3 = vld [vmem:[#allocation2 + $0x68] sm:$0xff]  ;;  %v100_v4 = vld [vmem:[#allocation2 + $0x60] sm:$0xff]  ;;  %v99_v5 = vld [vmem:[#allocation2 + $0x58] sm:$0xff] }
  0x32   :  { %593 = vmatprep.subr.mxu1 %v810_v0  ;;  %625 = vmatprep.mubr.msk.f32.mxu1 %vm811_vm0, %v810_v0  ;;  %v98_v6 = vld [vmem:[#allocation2 + $0x50] sm:$0xff]  ;;  %v97_v7 = vld [vmem:[#allocation2 + $0x48] sm:$0xff]  ;;  %v96_v8 = vld [vmem:[#allocation2 + $0x40] sm:$0xff] }
  0x33   :  { %559 = vmatpush3.msra.mxu0 %v103_v1  ;;  %v95_v9 = vld [vmem:[#allocation2 + $0x38] sm:$0xff]  ;;  %v94_v10 = vld [vmem:[#allocation2 + $0x30] sm:$0xff]  ;;  %v93_v11 = vld [vmem:[#allocation2 + $0x28] sm:$0xff] }
  0x34   :  { %560 = vmatprep.subr.mxu0 %v810_v0  ;;  %v92_v12 = vld [vmem:[#allocation2 + $0x20] sm:$0xff]  ;;  %v91_v13 = vld [vmem:[#allocation2 + $0x18] sm:$0xff]  ;;  %v90_v14 = vld [vmem:[#allocation2 + $0x10] sm:$0xff] }
  0x35   :  { %561 = vmatpush3.msra.mxu0 %v102_v2  ;;  %v89_v15 = vld [vmem:[#allocation2 + $0x8] sm:$0xff]  ;;  %v88_v16 = vld [vmem:[#allocation2] sm:$0xff]  ;;  %v202_v18 = vld [vmem:[#allocation4 + $0x78] sm:$0xff] }
  0x36   :  { %562 = vmatprep.subr.mxu0 %v810_v0  ;;  %v87_v17 = vld [vmem:[%s976_s0] sm:$0xff]  ;;  %594 = vmatpush3.msra.mxu1 %v202_v18  ;;  %v201_v19 = vld [vmem:[#allocation4 + $0x70] sm:$0xff]  ;;  %v200_v20 = vld [vmem:[#allocation4 + $0x68] sm:$0xff] }
  0x37   :  { %563 = vmatpush3.msra.mxu0 %v101_v3  ;;  %595 = vmatprep.subr.mxu1 %v810_v0  ;;  %v199_v21 = vld [vmem:[#allocation4 + $0x60] sm:$0xff]  ;;  %v198_v22 = vld [vmem:[#allocation4 + $0x58] sm:$0xff]  ;;  %v197_v23 = vld [vmem:[#allocation4 + $0x50] sm:$0xff] }
  0x38   :  { %564 = vmatprep.subr.mxu0 %v810_v0  ;;  %596 = vmatpush3.msra.mxu1 %v201_v19  ;;  %v196_v24 = vld [vmem:[#allocation4 + $0x48] sm:$0xff]  ;;  %v195_v25 = vld [vmem:[#allocation4 + $0x40] sm:$0xff]  ;;  %v194_v26 = vld [vmem:[#allocation4 + $0x38] sm:$0xff] }
  0x39   :  { %565 = vmatpush3.msra.mxu0 %v100_v4  ;;  %597 = vmatprep.subr.mxu1 %v810_v0  ;;  %v193_v27 = vld [vmem:[#allocation4 + $0x30] sm:$0xff]  ;;  %v192_v28 = vld [vmem:[#allocation4 + $0x28] sm:$0xff]  ;;  %v191_v29 = vld [vmem:[#allocation4 + $0x20] sm:$0xff] }
  0x3a   :  { %566 = vmatprep.subr.mxu0 %v810_v0  ;;  %598 = vmatpush3.msra.mxu1 %v200_v20  ;;  %v190_v30 = vld [vmem:[#allocation4 + $0x18] sm:$0xff]  ;;  %v189_v31 = vld [vmem:[#allocation4 + $0x10] sm:$0xff]  ;;  %v188_v32 = vld [vmem:[#allocation4 + $0x8] sm:$0xff] }
  0x3b   :  { %567 = vmatpush3.msra.mxu0 %v99_v5  ;;  %599 = vmatprep.subr.mxu1 %v810_v0  ;;  %v187_v33 = vld [vmem:[#allocation4] sm:$0xff]  ;;  %v301_v43 = vld [vmem:[#allocation6 + $0x78] sm:$0xff]  ;;  %v300_v44 = vld [vmem:[#allocation6 + $0x70] sm:$0xff] }
  0x3c   :  { %568 = vmatprep.subr.mxu0 %v810_v0  ;;  %600 = vmatpush3.msra.mxu1 %v199_v21  ;;  %v486_v34 = vld [vmem:[%s978_s2] ss:$0 sm:$0xff]  ;;  %v299_v45 = vld [vmem:[#allocation6 + $0x68] sm:$0xff]  ;;  %v297_v47 = vld [vmem:[#allocation6 + $0x58] sm:$0xff] }
  0x3d   :  { %569 = vmatpush3.msra.mxu0 %v98_v6  ;;  %601 = vmatprep.subr.mxu1 %v810_v0  ;;  %v298_v46 = vld [vmem:[#allocation6 + $0x60] sm:$0xff]  ;;  %v296_v48 = vld [vmem:[#allocation6 + $0x50] sm:$0xff]  ;;  %v295_v49 = vld [vmem:[#allocation6 + $0x48] sm:$0xff] }
  0x3e   :  { %570 = vmatprep.subr.mxu0 %v810_v0  ;;  %602 = vmatpush3.msra.mxu1 %v198_v22  ;;  %v294_v50 = vld [vmem:[#allocation6 + $0x40] sm:$0xff]  ;;  %v293_v51 = vld [vmem:[#allocation6 + $0x38] sm:$0xff]  ;;  %v292_v52 = vld [vmem:[#allocation6 + $0x30] sm:$0xff] }
  0x3f   :  { %571 = vmatpush3.msra.mxu0 %v97_v7  ;;  %603 = vmatprep.subr.mxu1 %v810_v0  ;;  %v291_v53 = vld [vmem:[#allocation6 + $0x28] sm:$0xff]  ;;  %v290_v54 = vld [vmem:[#allocation6 + $0x20] sm:$0xff]  ;;  %v289_v55 = vld [vmem:[#allocation6 + $0x18] sm:$0xff] }
  0x40   :  { %572 = vmatprep.subr.mxu0 %v810_v0  ;;  %604 = vmatpush3.msra.mxu1 %v197_v23  ;;  %v288_v56 = vld [vmem:[#allocation6 + $0x10] sm:$0xff]  ;;  %v287_v57 = vld [vmem:[#allocation6 + $0x8] sm:$0xff]  ;;  %v286_v58 = vld [vmem:[#allocation6] sm:$0xff] }
  0x41   :  { %573 = vmatpush3.msra.mxu0 %v96_v8  ;;  %605 = vmatprep.subr.mxu1 %v810_v0  ;;  %v487_v59 = vld [vmem:[%s980_s4] ss:$0 sm:$0xff]  ;;  %v400_v5 = vld [vmem:[#allocation7 + $0x78] sm:$0xff]  ;;  %v399_v6 = vld [vmem:[#allocation7 + $0x70] sm:$0xff] }
  0x42   :  { %574 = vmatprep.subr.mxu0 %v810_v0  ;;  %606 = vmatpush3.msra.mxu1 %v196_v24  ;;  %v398_v7 = vld [vmem:[#allocation7 + $0x68] sm:$0xff]  ;;  %v397_v8 = vld [vmem:[#allocation7 + $0x60] sm:$0xff]  ;;  %v387_v18 = vld [vmem:[#allocation7 + $0x10] sm:$0xff] }
  0x43   :  { %575 = vmatpush3.msra.mxu0 %v95_v9  ;;  %607 = vmatprep.subr.mxu1 %v810_v0  ;;  %v396_v9 = vld [vmem:[#allocation7 + $0x58] sm:$0xff]  ;;  %v386_v19 = vld [vmem:[#allocation7 + $0x8] sm:$0xff]  ;;  %v385_v20 = vld [vmem:[#allocation7] sm:$0xff] }
  0x44   :  { %576 = vmatprep.subr.mxu0 %v810_v0  ;;  %608 = vmatpush3.msra.mxu1 %v195_v25  ;;  %v488_v21 = vld [vmem:[%s982_s6] ss:$0 sm:$0xff] }
  0x45   :  { %577 = vmatpush3.msra.mxu0 %v94_v10  ;;  %609 = vmatprep.subr.mxu1 %v810_v0  ;;  %v395_v10 = vld [vmem:[#allocation7 + $0x50] sm:$0xff] }
  0x46   :  { %578 = vmatprep.subr.mxu0 %v810_v0  ;;  %610 = vmatpush3.msra.mxu1 %v194_v26 }
  0x47   :  { %579 = vmatpush3.msra.mxu0 %v93_v11  ;;  %611 = vmatprep.subr.mxu1 %v810_v0  ;;  %v394_v11 = vld [vmem:[#allocation7 + $0x48] sm:$0xff] }
  0x48   :  { %580 = vmatprep.subr.mxu0 %v810_v0  ;;  %612 = vmatpush3.msra.mxu1 %v193_v27 }
  0x49   :  { %581 = vmatpush3.msra.mxu0 %v92_v12  ;;  %613 = vmatprep.subr.mxu1 %v810_v0  ;;  %v393_v12 = vld [vmem:[#allocation7 + $0x40] sm:$0xff] }
  0x4a   :  { %582 = vmatprep.subr.mxu0 %v810_v0  ;;  %614 = vmatpush3.msra.mxu1 %v192_v28 }
  0x4b   :  { %583 = vmatpush3.msra.mxu0 %v91_v13  ;;  %615 = vmatprep.subr.mxu1 %v810_v0  ;;  %v392_v13 = vld [vmem:[#allocation7 + $0x38] sm:$0xff] }
  0x4c   :  { %584 = vmatprep.subr.mxu0 %v810_v0  ;;  %616 = vmatpush3.msra.mxu1 %v191_v29 }
  0x4d   :  { %585 = vmatpush3.msra.mxu0 %v90_v14  ;;  %617 = vmatprep.subr.mxu1 %v810_v0  ;;  %v391_v14 = vld [vmem:[#allocation7 + $0x30] sm:$0xff] }
  0x4e   :  { %586 = vmatprep.subr.mxu0 %v810_v0  ;;  %618 = vmatpush3.msra.mxu1 %v190_v30 }
  0x4f   :  { %587 = vmatpush3.msra.mxu0 %v89_v15  ;;  %619 = vmatprep.subr.mxu1 %v810_v0  ;;  %v390_v15 = vld [vmem:[#allocation7 + $0x28] sm:$0xff] }
  0x50   :  { %588 = vmatprep.subr.mxu0 %v810_v0  ;;  %620 = vmatpush3.msra.mxu1 %v189_v31 }
  0x51   :  { %589 = vmatpush3.msra.mxu0 %v88_v16  ;;  %621 = vmatprep.subr.mxu1 %v810_v0  ;;  %v389_v16 = vld [vmem:[#allocation7 + $0x20] sm:$0xff] }
  0x52   :  { %591 = vmatmul.mubr.f32.vlgmr.msra.gmra.mxu0 %v87_v17  ;;  %628 = vmatprep.subr.mxu0 %v810_v0  ;;  %v388_v17 = vld [vmem:[#allocation7 + $0x18] sm:$0xff] }
  0x53   :  { %660 = vmatprep.mubr.msk.f32.mxu0 %vm811_vm0, %v810_v0  ;;  %622 = vmatpush3.msra.mxu1 %v188_v32 }
  0x54   :  { %623 = vmatprep.subr.mxu1 %v810_v0  ;;  %629 = vmatpush3.msra.mxu0 %v301_v43 }
  0x55   :  { %624 = vmatpush3.msra.mxu1 %v187_v33  ;;  %630 = vmatprep.subr.mxu0 %v810_v0 }
  0x56   :  { %663 = vmatprep.subr.mxu1 %v810_v0  ;;  %631 = vmatpush3.msra.mxu0 %v300_v44 }
  0x57   :  { %632 = vmatprep.subr.mxu0 %v810_v0 }
  0x58   :  { %633 = vmatpush3.msra.mxu0 %v299_v45 }
  0x59   :  { %634 = vmatprep.subr.mxu0 %v810_v0 }
  0x5a   :  { %635 = vmatpush3.msra.mxu0 %v298_v46 }
  0x5b   :  { %636 = vmatprep.subr.mxu0 %v810_v0 }
  0x5c   :  { %637 = vmatpush3.msra.mxu0 %v297_v47 }
  0x5d   :  { %638 = vmatprep.subr.mxu0 %v810_v0 }
  0x5e   :  { %639 = vmatpush3.msra.mxu0 %v296_v48 }
  0x5f   :  { %640 = vmatprep.subr.mxu0 %v810_v0 }
  0x60   :  { %641 = vmatpush3.msra.mxu0 %v295_v49 }
  0x61   :  { %642 = vmatprep.subr.mxu0 %v810_v0 }
  0x62   :  { %643 = vmatpush3.msra.mxu0 %v294_v50 }
  0x63   :  { %644 = vmatprep.subr.mxu0 %v810_v0 }
  0x64   :  { %645 = vmatpush3.msra.mxu0 %v293_v51 }
  0x65   :  { %646 = vmatprep.subr.mxu0 %v810_v0 }
  0x66   :  { %647 = vmatpush3.msra.mxu0 %v292_v52 }
  0x67   :  { %648 = vmatprep.subr.mxu0 %v810_v0 }
  0x68   :  { %649 = vmatpush3.msra.mxu0 %v291_v53 }
  0x69   :  { %650 = vmatprep.subr.mxu0 %v810_v0 }
  0x6a   :  { %651 = vmatpush3.msra.mxu0 %v290_v54 }
  0x6b   :  { %652 = vmatprep.subr.mxu0 %v810_v0 }
  0x6c   :  { %653 = vmatpush3.msra.mxu0 %v289_v55 }
  0x6d   :  { %654 = vmatprep.subr.mxu0 %v810_v0 }
  0x6e   :  { %655 = vmatpush3.msra.mxu0 %v288_v56 }
  0x6f   :  { %656 = vmatprep.subr.mxu0 %v810_v0 }
  0x70   :  { %657 = vmatpush3.msra.mxu0 %v287_v57 }
  0x71   :  { %658 = vmatprep.subr.mxu0 %v810_v0 }
  0x72   :  { %659 = vmatpush3.msra.mxu0 %v286_v58 }
 0x112   :  { %v177_v35 = vpop.f32.mrf.mxu0 }
 0x113   :  { %v178_v36 = vadd.f32 %v486_v34, %v177_v35 }
 0x114   :  { %v592_v37 = vpop.f32.mrf.mxu0 }
 0x115   :  { %v181_v38 = vsub.f32 0.0, %v178_v36 }
 0x117   :  { %v182_v39 = vmul.f32 1.442695, %v181_v38 }
 0x119   :  { %706 = vpow2.f32 %v182_v39 }
 0x126   :  { %v707_v40 = vpop.eup %706 }
 0x127   :  { %v184_v41 = vadd.f32 1.0, %v707_v40 }
 0x129   :  { %708 = vrcp.f32 %v184_v41 }
 0x136   :  { %v709_v42 = vpop.eup %708 }
 0x137   :  { %626 = vmatmul.mubr.f32.vlgmr.msra.gmra.mxu1 %v709_v42 }
 0x138   :  { %695 = vmatprep.mubr.msk.f32.mxu1 %vm811_vm0, %v810_v0  ;;  %664 = vmatpush3.msra.mxu1 %v400_v5 }
 0x139   :  { %665 = vmatprep.subr.mxu1 %v810_v0 }
 0x13a   :  { %666 = vmatpush3.msra.mxu1 %v399_v6 }
 0x13b   :  { %667 = vmatprep.subr.mxu1 %v810_v0 }
 0x13c   :  { %668 = vmatpush3.msra.mxu1 %v398_v7 }
 0x13d   :  { %669 = vmatprep.subr.mxu1 %v810_v0 }
 0x13e   :  { %670 = vmatpush3.msra.mxu1 %v397_v8 }
 0x13f   :  { %671 = vmatprep.subr.mxu1 %v810_v0 }
 0x140   :  { %672 = vmatpush3.msra.mxu1 %v396_v9 }
 0x141   :  { %673 = vmatprep.subr.mxu1 %v810_v0 }
 0x142   :  { %674 = vmatpush3.msra.mxu1 %v395_v10 }
 0x143   :  { %675 = vmatprep.subr.mxu1 %v810_v0 }
 0x144   :  { %676 = vmatpush3.msra.mxu1 %v394_v11 }
 0x145   :  { %677 = vmatprep.subr.mxu1 %v810_v0 }
 0x146   :  { %678 = vmatpush3.msra.mxu1 %v393_v12 }
 0x147   :  { %679 = vmatprep.subr.mxu1 %v810_v0 }
 0x148   :  { %680 = vmatpush3.msra.mxu1 %v392_v13 }
 0x149   :  { %681 = vmatprep.subr.mxu1 %v810_v0 }
 0x14a   :  { %682 = vmatpush3.msra.mxu1 %v391_v14 }
 0x14b   :  { %683 = vmatprep.subr.mxu1 %v810_v0 }
 0x14c   :  { %684 = vmatpush3.msra.mxu1 %v390_v15 }
 0x14d   :  { %685 = vmatprep.subr.mxu1 %v810_v0 }
 0x14e   :  { %686 = vmatpush3.msra.mxu1 %v389_v16 }
 0x14f   :  { %687 = vmatprep.subr.mxu1 %v810_v0 }
 0x150   :  { %688 = vmatpush3.msra.mxu1 %v388_v17 }
 0x151   :  { %689 = vmatprep.subr.mxu1 %v810_v0 }
 0x152   :  { %690 = vmatpush3.msra.mxu1 %v387_v18 }
 0x153   :  { %691 = vmatprep.subr.mxu1 %v810_v0 }
 0x154   :  { %692 = vmatpush3.msra.mxu1 %v386_v19 }
 0x155   :  { %693 = vmatprep.subr.mxu1 %v810_v0  ;;  %v489_v0 = vld [vmem:[%s984_s8] ss:$0 sm:$0xff] }
 0x156   :  { %694 = vmatpush3.msra.mxu1 %v385_v20 }
 0x1f7   :  { %v276_v60 = vpop.f32.mrf.mxu1 }
 0x1f8   :  { %v277_v61 = vadd.f32 %v487_v59, %v276_v60 }
 0x1f9   :  { %v627_v62 = vpop.f32.mrf.mxu1 }
 0x1fa   :  { %v280_v63 = vsub.f32 0.0, %v277_v61 }
 0x1fc   :  { %v281_v1 = vmul.f32 1.442695, %v280_v63 }
 0x1fe   :  { %710 = vpow2.f32 %v281_v1 }
 0x20b   :  { %v711_v2 = vpop.eup %710 }
 0x20c   :  { %v283_v3 = vadd.f32 1.0, %v711_v2 }
 0x20e   :  { %712 = vrcp.f32 %v283_v3 }
 0x21b   :  { %v713_v4 = vpop.eup %712 }
 0x21c   :  { %661 = vmatmul.mubr.f32.vlgmr.msra.gmra.mxu0 %v713_v4 }
 0x2dc   :  { %v375_v22 = vpop.f32.mrf.mxu0 }
 0x2dd   :  { %v376_v23 = vadd.f32 %v488_v21, %v375_v22 }
 0x2de   :  { %v662_v24 = vpop.f32.mrf.mxu0 }
 0x2df   :  { %v379_v25 = vsub.f32 0.0, %v376_v23 }
 0x2e1   :  { %v380_v26 = vmul.f32 1.442695, %v379_v25 }
 0x2e3   :  { %714 = vpow2.f32 %v380_v26 }
 0x2f0   :  { %v715_v27 = vpop.eup %714 }
 0x2f1   :  { %v382_v28 = vadd.f32 1.0, %v715_v27 }
 0x2f3   :  { %716 = vrcp.f32 %v382_v28 }
 0x300   :  { %v717_v29 = vpop.eup %716 }
 0x301   :  { %696 = vmatmul.mubr.f32.vlgmr.msra.gmra.mxu1 %v717_v29 }
 0x3c1   :  { %v474_v30 = vpop.f32.mrf.mxu1 }
 0x3c2   :  { %v475_v31 = vadd.f32 %v489_v0, %v474_v30 }
 0x3c3   :  { %v697_v32 = vpop.f32.mrf.mxu1 }
 0x3c4   :  { %478 = vst [vmem:[%s985_s9] sm:$0xff] %v475_v31 }
 0x3c5   :  { %483 = vsyncpa [#allocation3], 1 }
 0x3c6   :  { %484 = vsyncpa [#allocation5], 1 }
 0x3c7   :  { %485 = vsyncpa [#allocation8], 1 }

</bundles_post_ra>
